<compile_context>
chip_gen: v7x
topology: tpu7x:2x2x1
jax: 0.10.0
libtpu: 0.0.40
codegen_flags: <defaults>
</compile_context>

<pallas_src>
import functools
import math

import jax
import jax.numpy as jnp
from jax.experimental import pallas as pl
from jax.experimental.pallas import tpu as pltpu


def _rmsnorm_kernel(x_ref, w_ref, o_ref, *, eps, k, d, approx_recip):
    x = x_ref[...].astype(jnp.float32)               # (tile_rows, D)

    if k == d:
        sq = x * x
    elif k % 128 == 0:
        # pRMSNorm, lane-aligned k: static slice, no mask needed.
        xk = x[:, :k]
        sq = xk * xk
    else:
        # pRMSNorm, unaligned k: mask the tail of the statistic.
        col = jax.lax.broadcasted_iota(jnp.int32, x.shape, dimension=1)
        sq = jnp.where(col < k, x * x, 0.0)

    ss = jnp.sum(sq, axis=-1, keepdims=True)          # (tile_rows, 1), f32 accum
    rms = jnp.sqrt(ss) * (float(k) ** -0.5)           # ||x||_2 / sqrt(k)
    inv = pl.reciprocal(rms + eps, approx=approx_recip)

    w = w_ref[...].astype(jnp.float32)                # (1, D)
    o_ref[...] = (w * (x * inv)).astype(o_ref.dtype)


def _round_up(a, b):
    return ((a + b - 1) // b) * b


def _pick_tile_rows(rows, d, itemsize):
    """Largest dtype-aware row tile fitting a conservative VMEM budget."""
    sublane = max(8, 32 // itemsize)                  # 8 f32 / 16 bf16 / 32 int8
    # Per-row bytes resident in VMEM: 2x double-buffered (in + out) tiles in
    # the native dtype, plus f32 working copies inside the kernel.
    per_row = d * (4 * itemsize + 8)
    budget = 28 * 1024 * 1024                         # safe on v5e/v6e/v7x
    tile = max(sublane, (budget // per_row) // sublane * sublane)
    tile = min(tile, 2048)
    tile = min(tile, _round_up(rows, sublane))
    if rows > 2 * sublane:
        # Keep >= 2 grid steps so v7x can shard rows across its 2 TensorCores.
        tile = min(tile, _round_up(-(-rows // 2), sublane))
    return max(tile, sublane)


def rms_norm(x, weight, *, p=1.0, eps=1e-5, tile_rows=None, approx_recip=False):
    """RMSNorm / pRMSNorm over the last dim of x. weight has shape (x.shape[-1],)."""
    orig_shape = x.shape
    d = orig_shape[-1]
    rows = math.prod(orig_shape[:-1]) if len(orig_shape) > 1 else 1
    x2 = x.reshape(rows, d)
    w2 = weight.reshape(1, d)

    k = d if p >= 1.0 else int(d * p)

    itemsize = jnp.dtype(x.dtype).itemsize
    sublane = max(8, 32 // itemsize)
    if tile_rows is None:
        tile_rows = _pick_tile_rows(rows, d, itemsize)
    else:
        tile_rows = max(sublane, _round_up(min(tile_rows, rows), sublane))

    # Pad rows (instead of asserting divisibility) so big tiles always apply.
    padded_rows = _round_up(rows, tile_rows)
    if padded_rows != rows:
        x2 = jnp.pad(x2, ((0, padded_rows - rows), (0, 0)))
    grid = padded_rows // tile_rows

    # Explicit scoped-VMEM limit: double-buffered in/out tiles + weight + f32
    # temps, 25% headroom, clamped to [16 MiB, 48 MiB] (safe on v7x's 64 MiB).
    vmem_needed = (
        2 * 2 * tile_rows * d * itemsize
        + 2 * d * jnp.dtype(weight.dtype).itemsize
        + 2 * tile_rows * d * 4
    )
    vmem_limit = int(min(max(vmem_needed * 5 // 4, 16 * 1024 * 1024),
                         48 * 1024 * 1024))

    kernel = functools.partial(
        _rmsnorm_kernel, eps=float(eps), k=k, d=d, approx_recip=approx_recip)

    out = pl.pallas_call(
        kernel,
        out_shape=jax.ShapeDtypeStruct((padded_rows, d), x.dtype),
        grid_spec=pltpu.PrefetchScalarGridSpec(
            num_scalar_prefetch=0,
            grid=(grid,),
            in_specs=[
                pl.BlockSpec((tile_rows, d), lambda i: (i, 0)),
                pl.BlockSpec((1, d), lambda i: (0, 0)),
            ],
            out_specs=pl.BlockSpec((tile_rows, d), lambda i: (i, 0)),
        ),
        compiler_params=pltpu.CompilerParams(
            dimension_semantics=("parallel",),
            vmem_limit_bytes=vmem_limit,
        ),
    )(x2, w2)

    if padded_rows != rows:
        out = out[:rows]
    return out.reshape(orig_shape)


def rms_norm_ref(x, weight, *, p=1.0, eps=1e-5):
    """Pure-JAX reference (computed in f32), matching the torch module."""
    xf = x.astype(jnp.float32)
    wf = weight.astype(jnp.float32)
    d = xf.shape[-1]
    if p >= 1.0:
        k = d
        norm = jnp.linalg.norm(xf, axis=-1, keepdims=True)
    else:
        k = int(d * p)
        norm = jnp.linalg.norm(xf[..., :k], axis=-1, keepdims=True)
    rms = norm * (k ** -0.5)
    return wf * (xf / (rms + eps))


if __name__ == "__main__":
    key = jax.random.PRNGKey(0)
    k0, k1, k2 = jax.random.split(key, 3)

    # --- Case 1: module-default small shape, f32, full RMSNorm, exact recip.
    x = jax.random.normal(k0, (2, 8, 32), dtype=jnp.float32)
    w = jnp.ones((32,), dtype=jnp.float32)          # RMSNorm.reset_parameters
    out = jax.block_until_ready(rms_norm(x, w, p=1.0, eps=1e-5))
    ref = rms_norm_ref(x, w, p=1.0, eps=1e-5)
    assert out.shape == x.shape and out.dtype == x.dtype
    assert jnp.allclose(out, ref, atol=1e-5, rtol=1e-5), "case 1 mismatch"

    # --- Case 2: f32, pRMSNorm with unaligned k (k = 16, masked-iota path).
    out2 = jax.block_until_ready(rms_norm(x, w, p=0.5, eps=1e-5))
    ref2 = rms_norm_ref(x, w, p=0.5, eps=1e-5)
    assert jnp.allclose(out2, ref2, atol=1e-5, rtol=1e-5), "case 2 mismatch"

    # --- Case 3: bf16, lane-aligned D (256), non-divisible row count (2*7=14
    #     rows -> exercises padding), pRMSNorm with aligned k (128), approx
    #     reciprocal (EUP path), non-trivial weight.
    xb = jax.random.normal(k1, (2, 7, 256), dtype=jnp.float32).astype(jnp.bfloat16)
    wb = (1.0 + 0.1 * jax.random.normal(k2, (256,), dtype=jnp.float32)
          ).astype(jnp.bfloat16)
    out3 = jax.block_until_ready(
        rms_norm(xb, wb, p=0.5, eps=1e-5, approx_recip=True))
    ref3 = rms_norm_ref(xb, wb, p=0.5, eps=1e-5)
    assert out3.shape == xb.shape and out3.dtype == xb.dtype
    assert jnp.allclose(out3.astype(jnp.float32), ref3, atol=3e-2, rtol=3e-2), \
        "case 3 mismatch"

    print("KERNEL_OK")
</pallas_src>

<mosaic_0001>
module attributes {stable_mosaic.version = 11 : i64} {
  func.func @_rmsnorm_kernel(%arg0: i32, %arg1: memref<16x32xf32, #tpu.memory_space<vmem>>, %arg2: memref<1x32xf32, #tpu.memory_space<vmem>>, %arg3: memref<16x32xf32, #tpu.memory_space<vmem>>) attributes {dimension_semantics = [#tpu.dimension_semantics<parallel>], iteration_bounds = array<i64: 1>, scalar_prefetch = 0 : i64, scratch_operands = 0 : i64, tpu.core_type = #tpu.core_type<tc>, window_params = [{transform_indices = @transform_0, window_bounds = array<i64: 16, 32>}, {pipeline_mode = #tpu.pipeline_mode<synchronous>, transform_indices = @transform_1, window_bounds = array<i64: 1, 32>}, {transform_indices = @transform_2, window_bounds = array<i64: 16, 32>}]} {
    %c0 = arith.constant 0 : index
    %c0_0 = arith.constant 0 : index
    %0 = vector.load %arg1[%c0, %c0_0] : memref<16x32xf32, #tpu.memory_space<vmem>>, vector<16x32xf32>
    %1 = arith.mulf %0, %0 : vector<16x32xf32>
    %cst = arith.constant dense<0.000000e+00> : vector<16xf32>
    %2 = vector.multi_reduction <add>, %1, %cst [1] : vector<16x32xf32> to vector<16xf32>
    %3 = vector.shape_cast %2 : vector<16xf32> to vector<16x1xf32>
    %4 = math.sqrt %3 : vector<16x1xf32>
    %cst_1 = arith.constant 0.176776692 : f32
    %5 = vector.broadcast %cst_1 : f32 to vector<16x1xf32>
    %6 = arith.mulf %4, %5 : vector<16x1xf32>
    %cst_2 = arith.constant 9.99999974E-6 : f32
    %7 = vector.broadcast %cst_2 : f32 to vector<16x1xf32>
    %8 = arith.addf %6, %7 : vector<16x1xf32>
    %9 = tpu.reciprocal %8 : vector<16x1xf32> -> vector<16x1xf32>
    %c0_3 = arith.constant 0 : index
    %c0_4 = arith.constant 0 : index
    %10 = vector.load %arg2[%c0_3, %c0_4] : memref<1x32xf32, #tpu.memory_space<vmem>>, vector<1x32xf32>
    %11 = vector.broadcast %9 : vector<16x1xf32> to vector<16x32xf32>
    %12 = arith.mulf %0, %11 : vector<16x32xf32>
    %13 = vector.broadcast %10 : vector<1x32xf32> to vector<16x32xf32>
    %14 = arith.mulf %13, %12 : vector<16x32xf32>
    %c0_5 = arith.constant 0 : index
    %c0_6 = arith.constant 0 : index
    %15 = vector.load %arg3[%c0_5, %c0_6] : memref<16x32xf32, #tpu.memory_space<vmem>>, vector<16x32xf32>
    tpu.vector_store %arg3[%c0_5, %c0_6], %14 {strides = array<i32>} : memref<16x32xf32, #tpu.memory_space<vmem>>, vector<16x32xf32>,
    return
  }
  func.func @transform_0(%arg0: i32) -> (i32, i32) {
    %c0_i32 = arith.constant 0 : i32
    %c0_i32_0 = arith.constant 0 : i32
    return %arg0, %c0_i32 : i32, i32
  }
  func.func @transform_1(%arg0: i32) -> (i32, i32) {
    %c0_i32 = arith.constant 0 : i32
    %c0_i32_0 = arith.constant 0 : i32
    %c0_i32_1 = arith.constant 0 : i32
    return %c0_i32, %c0_i32_0 : i32, i32
  }
  func.func @transform_2(%arg0: i32) -> (i32, i32) {
    %c0_i32 = arith.constant 0 : i32
    %c0_i32_0 = arith.constant 0 : i32
    return %arg0, %c0_i32 : i32, i32
  }
}

</mosaic_0001>

<bundles_post_ra>
// kernel: tpu_custom_call.1
= control target key start
LH: loop header
LB: loop body
LE: loop exit
PB: predicated region body
PF: predicated region fallthrough
CT: control target
= control target key end

     0   :  { %7 = vsyncpa [#allocation3], 0  ;;  %s204_s0 = inlined_call_operand.hbm [shape: f32[16,32], index: 0, kind: input, shape index: {}]   ;;  %s205_s1 = inlined_call_operand.vmem [shape: f32[1,32], index: 1, kind: input, shape index: {}]   ;;  %s206_s2 = inlined_call_operand.hbm [shape: f32[16,32], index: 2, kind: output, shape index: {}]  }
   0x1   :  { %8 = vsyncpa [#allocation4], 0  ;;  %s148_s9 = smov [#allocation2]   ;;  %s100_s13 = scalar_lea.hbm %s204_s0, 256 }
   0x2   :  { %s14_s10 = sshll.u32 %s148_s9, 4  ;;  %p101_p0 = scmp.ne.s32.totalorder %s204_s0, %s100_s13  ;;  %s15_s10 = int_to_ptr.vmem [resolvable:$true] %s14_s10 }
   0x3   :  { %p104_p1 = scmp.lt.u32.totalorder %s100_s13, %s204_s0 }
   0x5   :  { %p106_p2 = pnand %p104_p1, %p101_p0 }
   0x7   :  { %109 = shalt.err (!%p106_p2)
}
   0x8   :  { %s110_s18 = scalar_lea.vmem %s15_s10, 256  ;;  %p115_p4 = scmp.lt.s32.totalorder %s15_s10, %s15_s10 }
   0x9   :  { %p111_p3 = scmp.ne.s32.totalorder %s15_s10, %s110_s18  ;;  %p116_p5 = scmp.lt.s32.totalorder %s110_s18, %s110_s18 }
   0xb   :  { %p117_p6 = por %p116_p5, %p115_p4 }
   0xd   :  { %p118_p7 = pnand %p117_p6, %p111_p3 }
   0xf   :  { %121 = shalt.err (!%p118_p7)
}
  0x10   :  { %s149_s19 = smov 128   ;;  %s150_s20 = smov 8  }
  0x11   :  { %20 = dma.hbm_to_vmem [thread:$0]  %s204_s0, 256, %s15_s10, [#allocation3], %s149_s19, %s149_s19, %s150_s20  }
  0x12   :  { %144 = dma.done.wait [#allocation3], 256  }
  0x13   :  { %145 = vsyncadd [#allocation3], 4294967040  ;;  %v26_v0 = vld [vmem:[#allocation2] sm:$0xff]  ;;  %vm30_vm0 = vcmask 261120   ;;  %v27_v1 = vld [vmem:[#allocation2 + $0x8] sm:$0xff]  ;;  %s151_s24 = smov [#allocation5]  }
  0x14   :  { %v28_v2 = vmul.f32 %v26_v0, %v26_v0  ;;  %v29_v3 = vmul.f32 %v27_v1, %v27_v1  ;;  %v87_v23 = vld [vmem:[%s205_s1] ss:$0 sm:$0xff]  ;;  %s75_s25 = sshll.u32 %s151_s24, 4  ;;  %s76_s25 = int_to_ptr.vmem [resolvable:$true] %s75_s25 }
  0x15   :  { %s122_s26 = scalar_lea.vmem %s76_s25, 256  ;;  %p127_p9 = scmp.lt.s32.totalorder %s76_s25, %s76_s25 }
  0x16   :  { %v31_v4 = vsel %vm30_vm0, %v28_v2, 0.0  ;;  %v34_v5 = vsel %vm30_vm0, %v29_v3, 0.0  ;;  %p123_p8 = scmp.ne.s32.totalorder %s76_s25, %s122_s26  ;;  %p128_p10 = scmp.lt.s32.totalorder %s122_s26, %s122_s26 }
  0x17   :  { %32 = vadd.xlane.f32.xlu0 %v31_v4 }
  0x18   :  { %p129_p11 = por %p128_p10, %p127_p9 }
  0x1a   :  { %p130_p12 = pnand %p129_p11, %p123_p8 }
  0x1b   :  { %35 = vadd.xlane.f32.xlu0 %v34_v5 }
  0xa4   :  { %v33_v6 = vpop.xlane.xlu0 %32 }
  0xa5   :  { %92 = vrsqrt.f32 %v33_v6  ;;  %vm39_vm1 = vcmp.eq.f32.partialorder %v33_v6, inf  ;;  %v42_v10 = vand.u32 2147483648, %v33_v6  ;;  %vm41_vm2 = vcmp.eq.f32.partialorder %v33_v6, 0.0 }
  0xa8   :  { %v36_v7 = vpop.xlane.xlu0 %35 }
  0xa9   :  { %94 = vrsqrt.f32 %v36_v7  ;;  %vm46_vm3 = vcmp.eq.f32.partialorder %v36_v7, inf  ;;  %v49_v16 = vand.u32 2147483648, %v36_v7  ;;  %vm48_vm4 = vcmp.eq.f32.partialorder %v36_v7, 0.0 }
  0xaf   :  { %v93_v8 = vpop.eup %92 }
  0xb0   :  { %v38_v9 = vmul.f32 %v93_v8, %v33_v6 }
  0xb2   :  { %v40_v11 = vsel %vm39_vm1, %v33_v6, %v38_v9 }
  0xb3   :  { %v95_v12 = vpop.eup %94  ;;  %v43_v13 = vsel %vm41_vm2, %v42_v10, %v40_v11 }
  0xb4   :  { %v51_v14 = vmul.f32 0.17677669, %v43_v13  ;;  %v45_v15 = vmul.f32 %v95_v12, %v36_v7 }
  0xb6   :  { %v53_v17 = vadd.f32 1e-05, %v51_v14  ;;  %v47_v18 = vsel %vm46_vm3, %v36_v7, %v45_v15 }
  0xb7   :  { %v50_v19 = vsel %vm48_vm4, %v49_v16, %v47_v18 }
  0xb8   :  { %96 = vrcp.f32 %v53_v17  ;;  %v52_v20 = vmul.f32 0.17677669, %v50_v19 }
  0xba   :  { %v54_v21 = vadd.f32 1e-05, %v52_v20 }
  0xbc   :  { %98 = vrcp.f32 %v54_v21 }
  0xc2   :  { %v97_v22 = vpop.eup %96 }
  0xc3   :  { %v58_v24 = vmul.f32 %v97_v22, %v26_v0 }
  0xc5   :  { %v66_v25 = vmul.f32 %v87_v23, %v58_v24 }
  0xc6   :  { %v99_v26 = vpop.eup %98 }
  0xc7   :  { %v59_v27 = vmul.f32 %v99_v26, %v27_v1  ;;  %68 = vst.msk [vmem:[#allocation5] sm:$0xff] %vm30_vm0, %v66_v25 }
  0xc9   :  { %v67_v28 = vmul.f32 %v87_v23, %v59_v27 }
  0xcb   :  { %69 = vst.msk [vmem:[#allocation5 + $0x8] sm:$0xff] %vm30_vm0, %v67_v28 }
  0xcc   :  { %133 = shalt.err (!%p130_p12)
}
  0xcd   :  { %s134_s28 = scalar_lea.hbm %s206_s2, 256 }
  0xce   :  { %p135_p13 = scmp.ne.s32.totalorder %s206_s2, %s134_s28  ;;  %p138_p0 = scmp.lt.u32.totalorder %s134_s28, %s206_s2 }
  0xd0   :  { %p140_p1 = pnand %p138_p0, %p135_p13 }
  0xd2   :  { %143 = shalt.err (!%p140_p1)
}
  0xd3   :  { %81 = dma.vmem_to_hbm [thread:$0]  %s76_s25, 256, %s206_s2, [#allocation4], %s149_s19, %s149_s19, %s150_s20  }
  0xd4   :  { %146 = dma.done.wait [#allocation4], 256  }
  0xd5   :  { %147 = vsyncadd [#allocation4], 4294967040 }
  0xd6   :  { %85 = vsyncpa [#allocation3], 1 }
  0xd7   :  { %86 = vsyncpa [#allocation4], 1 }

</bundles_post_ra>
